<compile_context>
chip_gen: v7x
topology: tpu7x:2x2x1
jax: 0.10.0
libtpu: 0.0.40
codegen_flags: <defaults>
</compile_context>

<pallas_src>
import functools

import jax
import jax.numpy as jnp
from jax import lax
from jax.experimental import pallas as pl
from jax.experimental.pallas import tpu as pltpu

ALPHA = 0.5
GAMMA = 2.0
LANES = 128
SUBLANES = 8
# (2048, 128) f32 block = 1 MiB; 2 inputs x 2 pipeline buffers = 4 MiB.
MAX_TILE_ROWS = 2048


def _cdiv(a, b):
    return (a + b - 1) // b


def _round_up(a, b):
    return _cdiv(a, b) * b


def _num_tensorcores():
    """TensorCores addressable by a single Pallas kernel (v7x: 2, else 1)."""
    try:
        kind = jax.devices()[0].device_kind.lower()
    except Exception:
        return 1
    if "v7" in kind or "7x" in kind:
        return 2
    return 1


def _focal_loss_kernel(p_ref, t_ref, out_ref, *, gamma, hard_targets, rows,
                       tile_rows, fold_rows, inner_steps, grid_tiles,
                       two_d_grid):
    if two_d_grid:
        c = pl.program_id(0)          # core / split axis (CORE_PARALLEL on v7x)
        i = pl.program_id(1)          # inner streaming (reduction) axis
        tile_idx = c * inner_steps + i
    else:
        i = pl.program_id(0)
        tile_idx = i

    # Output block index only depends on the split axis, so it stays resident
    # across the inner reduction axis: init at step 0, accumulate every step.
    @pl.when(i == 0)
    def _init():
        out_ref[...] = jnp.zeros_like(out_ref)

    p = p_ref[...].astype(jnp.float32)

    if hard_targets:
        # Exact for {0,1} targets: one log, no exp per element.
        t_is_one = t_ref[...].astype(jnp.float32) >= 0.5
        pt = jnp.where(t_is_one, p, 1.0 - p)
        bce = -jnp.maximum(jnp.log(pt), -100.0)   # PyTorch's log clamp at -100
    else:
        # General (soft-target safe) path, matching F.binary_cross_entropy.
        t = t_ref[...].astype(jnp.float32)
        log_p = jnp.maximum(jnp.log(p), -100.0)
        log_1mp = jnp.maximum(jnp.log(1.0 - p), -100.0)
        s = log_1mp + t * (log_p - log_1mp)       # == -BCE (saves VALU ops)
        bce = -s
        pt = jnp.exp(s)

    d = 1.0 - pt
    if gamma == 2.0:
        mod = d * d                               # avoid pow -> exp/log on EUP
    elif gamma == 1.0:
        mod = d
    elif gamma == 0.0:
        mod = jnp.ones_like(d)
    else:
        mod = d ** gamma
    f_loss = mod * bce                            # alpha folded into the wrapper

    def _accumulate(x):
        if fold_rows == tile_rows:
            out_ref[...] += x
        else:
            # Fold the (tile_rows, 128) tile into an (8, 128) partial sum with
            # pure VPU adds (reshape splits the sublane axis on an 8-boundary).
            out_ref[...] += jnp.sum(
                x.reshape(tile_rows // fold_rows, fold_rows, LANES), axis=0)

    if grid_tiles * tile_rows > rows:
        # Grid over-covers the array: mask the ragged tail rows (and any fully
        # out-of-range tile slots on the 2-core split).  Gated with pl.when so
        # full tiles pay zero masking cost.
        start = tile_idx * tile_rows
        is_full = start + tile_rows <= rows

        @pl.when(is_full)
        def _full():
            _accumulate(f_loss)

        @pl.when(jnp.logical_not(is_full))
        def _tail():
            row_ids = lax.broadcasted_iota(jnp.int32, (tile_rows, LANES), 0)
            _accumulate(jnp.where(start + row_ids < rows, f_loss, 0.0))
    else:
        _accumulate(f_loss)


def focal_loss(inputs, targets, alpha=ALPHA, gamma=GAMMA, hard_targets=False):
    """Mean focal loss over all elements (logits=False, reduce=True).

    Set hard_targets=True only when targets are exactly {0, 1}; it enables a
    1-log / 0-exp fast path that is exact for binary targets.
    """
    assert inputs.shape == targets.shape
    n_valid = int(inputs.size)

    flat_p = inputs.reshape(-1)    # free reshape for contiguous row-major input
    flat_t = targets.reshape(-1)

    rem = n_valid % LANES
    if rem:
        # Rare ragged fallback (size not a multiple of 128): pad to the next
        # full lane row with p=1/t=1, which contributes exactly 0.
        # TODO(synk): this costs one extra HBM pass over both tensors; keep
        # tensor sizes 128-aligned upstream to stay on the no-pad fast path.
        pad = LANES - rem
        flat_p = jnp.pad(flat_p, (0, pad), constant_values=1)
        flat_t = jnp.pad(flat_t, (0, pad), constant_values=1)

    rows = flat_p.shape[0] // LANES
    p2d = flat_p.reshape(rows, LANES)
    t2d = flat_t.reshape(rows, LANES)

    # Generation-aware split: only use >1 splits when there are multiple
    # TensorCores (v7x) and enough rows to feed them.
    num_cores = _num_tensorcores()
    num_splits = num_cores if (num_cores > 1 and rows >= num_cores * SUBLANES) else 1

    # Adaptive tiling: biggest block that fits the budget; whole array in one
    # block when it is small (block == full array dims is always legal).
    cand = min(MAX_TILE_ROWS, _round_up(_cdiv(rows, num_splits), SUBLANES))
    tile_rows = rows if cand >= rows else cand
    total_tiles = _cdiv(rows, tile_rows)
    inner_steps = _cdiv(total_tiles, num_splits)
    grid_tiles = num_splits * inner_steps
    fold_rows = SUBLANES if tile_rows % SUBLANES == 0 else tile_rows

    kernel = functools.partial(
        _focal_loss_kernel,
        gamma=float(gamma), hard_targets=bool(hard_targets), rows=rows,
        tile_rows=tile_rows, fold_rows=fold_rows, inner_steps=inner_steps,
        grid_tiles=grid_tiles, two_d_grid=(num_splits > 1))

    if num_splits > 1:
        grid = (num_splits, inner_steps)
        if grid_tiles > total_tiles:
            def in_map(c, i):
                # Clamp fully-out-of-range tile slots onto the last real tile
                # so the pipeline DMA stays in bounds; the kernel masks their
                # contribution to exactly zero.
                return (jnp.minimum(c * inner_steps + i, total_tiles - 1), 0)
        else:
            def in_map(c, i):
                return (c * inner_steps + i, 0)
        out_map = lambda c, i: (c, 0)
        dim_sem = (pltpu.CORE_PARALLEL, pltpu.ARBITRARY)   # real 2-TC split on v7x
    else:
        grid = (total_tiles,)
        in_map = lambda i: (i, 0)
        out_map = lambda i: (0, 0)
        dim_sem = (pltpu.ARBITRARY,)                       # reduction axis

    partials = pl.pallas_call(
        kernel,
        out_shape=jax.ShapeDtypeStruct((num_splits * fold_rows, LANES),
                                       jnp.float32),
        grid_spec=pltpu.PrefetchScalarGridSpec(
            num_scalar_prefetch=0,
            grid=grid,
            in_specs=[pl.BlockSpec((tile_rows, LANES), in_map),
                      pl.BlockSpec((tile_rows, LANES), in_map)],
            out_specs=pl.BlockSpec((fold_rows, LANES), out_map),
        ),
        compiler_params=pltpu.CompilerParams(
            dimension_semantics=dim_sem,
            vmem_limit_bytes=32 * 1024 * 1024,
        ),
    )(p2d, t2d)

    # reduce=True -> mean over the original element count; alpha applied here
    # (folded out of the per-element kernel math).
    return jnp.sum(partials) * jnp.float32(alpha / n_valid)


def focal_loss_ref(inputs, targets, alpha=ALPHA, gamma=GAMMA):
    p = inputs.astype(jnp.float32)
    t = targets.astype(jnp.float32)
    log_p = jnp.maximum(jnp.log(p), -100.0)
    log_1mp = jnp.maximum(jnp.log(1.0 - p), -100.0)
    bce = -(t * log_p + (1.0 - t) * log_1mp)
    pt = jnp.exp(-bce)
    return jnp.mean(alpha * (1.0 - pt) ** gamma * bce)


if __name__ == "__main__":
    key = jax.random.PRNGKey(0)
    k1, k2 = jax.random.split(key)
    # NCHW-style probabilities (logits=False) and hard binary targets.
    x = jax.nn.sigmoid(jax.random.normal(k1, (2, 4, 16, 16), jnp.float32))
    y = (jax.random.uniform(k2, (2, 4, 16, 16)) > 0.5).astype(jnp.float32)

    ref = focal_loss_ref(x, y)

    # Generic path (soft-target safe: keeps exp(-BCE)).
    loss = jax.block_until_ready(focal_loss(x, y))
    assert jnp.allclose(loss, ref, rtol=1e-4, atol=1e-6), (loss, ref)

    # Hard-target fast path (1 log / 0 exp per element); exact for {0,1} y.
    loss_hard = jax.block_until_ready(focal_loss(x, y, hard_targets=True))
    assert jnp.allclose(loss_hard, ref, rtol=1e-4, atol=1e-6), (loss_hard, ref)

    print("KERNEL_OK")
</pallas_src>

<mosaic_0001>
module attributes {stable_mosaic.version = 11 : i64} {
  func.func @_focal_loss_kernel(%arg0: i32, %arg1: memref<16x128xf32, #tpu.memory_space<vmem>>, %arg2: memref<16x128xf32, #tpu.memory_space<vmem>>, %arg3: memref<8x128xf32, #tpu.memory_space<vmem>>) attributes {dimension_semantics = [#tpu.dimension_semantics<arbitrary>], iteration_bounds = array<i64: 1>, scalar_prefetch = 0 : i64, scratch_operands = 0 : i64, tpu.core_type = #tpu.core_type<tc>, window_params = [{transform_indices = @transform_0, window_bounds = array<i64: 16, 128>}, {transform_indices = @transform_1, window_bounds = array<i64: 16, 128>}, {pipeline_mode = #tpu.pipeline_mode<synchronous>, transform_indices = @transform_2, window_bounds = array<i64: 8, 128>}]} {
    %c0_i32 = arith.constant 0 : i32
    %0 = arith.cmpi eq, %arg0, %c0_i32 : i32
    %1 = arith.extui %0 : i1 to i32
    %c0_i32_0 = arith.constant 0 : i32
    %2 = arith.cmpi ne, %1, %c0_i32_0 : i32
    scf.if %2 {
      %cst_13 = arith.constant 0.000000e+00 : f32
      %28 = vector.broadcast %cst_13 : f32 to vector<8x128xf32>
      %c0_14 = arith.constant 0 : index
      %c0_15 = arith.constant 0 : index
      %29 = vector.load %arg3[%c0_14, %c0_15] : memref<8x128xf32, #tpu.memory_space<vmem>>, vector<8x128xf32>
      tpu.vector_store %arg3[%c0_14, %c0_15], %28 {strides = array<i32>} : memref<8x128xf32, #tpu.memory_space<vmem>>, vector<8x128xf32>,
    } else {
    }
    %c0 = arith.constant 0 : index
    %c0_1 = arith.constant 0 : index
    %3 = vector.load %arg1[%c0, %c0_1] : memref<16x128xf32, #tpu.memory_space<vmem>>, vector<16x128xf32>
    %c0_2 = arith.constant 0 : index
    %c0_3 = arith.constant 0 : index
    %4 = vector.load %arg2[%c0_2, %c0_3] : memref<16x128xf32, #tpu.memory_space<vmem>>, vector<16x128xf32>
    %5 = math.log %3 : vector<16x128xf32>
    %cst = arith.constant -1.000000e+02 : f32
    %6 = vector.broadcast %cst : f32 to vector<16x128xf32>
    %7 = arith.maximumf %5, %6 : vector<16x128xf32>
    %cst_4 = arith.constant 1.000000e+00 : f32
    %8 = vector.broadcast %cst_4 : f32 to vector<16x128xf32>
    %9 = arith.subf %8, %3 : vector<16x128xf32>
    %10 = math.log %9 : vector<16x128xf32>
    %cst_5 = arith.constant -1.000000e+02 : f32
    %11 = vector.broadcast %cst_5 : f32 to vector<16x128xf32>
    %12 = arith.maximumf %10, %11 : vector<16x128xf32>
    %13 = arith.subf %7, %12 : vector<16x128xf32>
    %14 = arith.mulf %4, %13 : vector<16x128xf32>
    %15 = arith.addf %12, %14 : vector<16x128xf32>
    %cst_6 = arith.constant 0.000000e+00 : f32
    %16 = vector.broadcast %cst_6 : f32 to vector<16x128xf32>
    %17 = arith.subf %16, %15 : vector<16x128xf32>
    %18 = math.exp %15 : vector<16x128xf32>
    %cst_7 = arith.constant 1.000000e+00 : f32
    %19 = vector.broadcast %cst_7 : f32 to vector<16x128xf32>
    %20 = arith.subf %19, %18 : vector<16x128xf32>
    %21 = arith.mulf %20, %20 : vector<16x128xf32>
    %22 = arith.mulf %21, %17 : vector<16x128xf32>
    %c0_8 = arith.constant 0 : index
    %c0_9 = arith.constant 0 : index
    %23 = vector.load %arg3[%c0_8, %c0_9] : memref<8x128xf32, #tpu.memory_space<vmem>>, vector<8x128xf32>
    %24 = vector.shape_cast %22 : vector<16x128xf32> to vector<2x8x128xf32>
    %cst_10 = arith.constant dense<0.000000e+00> : vector<8x128xf32>
    %25 = vector.multi_reduction <add>, %24, %cst_10 [0] : vector<2x8x128xf32> to vector<8x128xf32>
    %26 = arith.addf %23, %25 : vector<8x128xf32>
    %c0_11 = arith.constant 0 : index
    %c0_12 = arith.constant 0 : index
    %27 = vector.load %arg3[%c0_11, %c0_12] : memref<8x128xf32, #tpu.memory_space<vmem>>, vector<8x128xf32>
    tpu.vector_store %arg3[%c0_11, %c0_12], %26 {strides = array<i32>} : memref<8x128xf32, #tpu.memory_space<vmem>>, vector<8x128xf32>,
    return
  }
  func.func @transform_0(%arg0: i32) -> (i32, i32) {
    %c0_i32 = arith.constant 0 : i32
    %c0_i32_0 = arith.constant 0 : i32
    return %arg0, %c0_i32 : i32, i32
  }
  func.func @transform_1(%arg0: i32) -> (i32, i32) {
    %c0_i32 = arith.constant 0 : i32
    %c0_i32_0 = arith.constant 0 : i32
    return %arg0, %c0_i32 : i32, i32
  }
  func.func @transform_2(%arg0: i32) -> (i32, i32) {
    %c0_i32 = arith.constant 0 : i32
    %c0_i32_0 = arith.constant 0 : i32
    %c0_i32_1 = arith.constant 0 : i32
    return %c0_i32, %c0_i32_0 : i32, i32
  }
}

</mosaic_0001>

<bundles_post_ra>
// kernel: tpu_custom_call.1
= control target key start
LH: loop header
LB: loop body
LE: loop exit
PB: predicated region body
PF: predicated region fallthrough
CT: control target
= control target key end

     0   :  { %7 = vsyncpa [#allocation3], 0  ;;  %s247_s0 = inlined_call_operand.hbm [shape: f32[16,128], index: 0, kind: input, shape index: {}]   ;;  %s248_s1 = inlined_call_operand.hbm [shape: f32[16,128], index: 1, kind: input, shape index: {}]   ;;  %s249_s2 = inlined_call_operand.hbm [shape: f32[8,128], index: 2, kind: output, shape index: {}]  }
   0x1   :  { %8 = vsyncpa [#allocation6], 0 }
   0x2   :  { %9 = vsyncpa [#allocation4], 0  ;;  %s191_s9 = smov [#allocation2]   ;;  %s119_s13 = scalar_lea.hbm %s247_s0, 256 }
   0x3   :  { %s15_s10 = sshll.u32 %s191_s9, 4  ;;  %p120_p0 = scmp.ne.s32.totalorder %s247_s0, %s119_s13  ;;  %s16_s10 = int_to_ptr.vmem [resolvable:$true] %s15_s10 }
   0x4   :  { %p123_p1 = scmp.lt.u32.totalorder %s119_s13, %s247_s0 }
   0x6   :  { %p125_p2 = pnand %p123_p1, %p120_p0 }
   0x8   :  { %128 = shalt.err (!%p125_p2)
}
   0x9   :  { %s129_s18 = scalar_lea.vmem %s16_s10, 256  ;;  %p134_p4 = scmp.lt.s32.totalorder %s16_s10, %s16_s10 }
   0xa   :  { %p130_p3 = scmp.ne.s32.totalorder %s16_s10, %s129_s18  ;;  %p135_p5 = scmp.lt.s32.totalorder %s129_s18, %s129_s18 }
   0xc   :  { %p136_p6 = por %p135_p5, %p134_p4 }
   0xe   :  { %p137_p7 = pnand %p136_p6, %p130_p3 }
  0x10   :  { %140 = shalt.err (!%p137_p7)
}
  0x11   :  { %s192_s19 = smov 128   ;;  %s193_s20 = smov 8  }
  0x12   :  { %21 = dma.hbm_to_vmem [thread:$0]  %s247_s0, 256, %s16_s10, [#allocation3], %s192_s19, %s192_s19, %s193_s20  }
  0x13   :  { %s194_s23 = smov [#allocation5]   ;;  %s141_s27 = scalar_lea.hbm %s248_s1, 256 }
  0x14   :  { %s27_s24 = sshll.u32 %s194_s23, 4  ;;  %p142_p8 = scmp.ne.s32.totalorder %s248_s1, %s141_s27  ;;  %s28_s24 = int_to_ptr.vmem [resolvable:$true] %s27_s24 }
  0x15   :  { %p145_p9 = scmp.lt.u32.totalorder %s141_s27, %s248_s1 }
  0x17   :  { %p147_p10 = pnand %p145_p9, %p142_p8 }
  0x19   :  { %150 = shalt.err (!%p147_p10)
}
  0x1a   :  { %s151_s4 = scalar_lea.vmem %s28_s24, 256  ;;  %p156_p12 = scmp.lt.s32.totalorder %s28_s24, %s28_s24 }
  0x1b   :  { %p152_p11 = scmp.ne.s32.totalorder %s28_s24, %s151_s4  ;;  %p157_p13 = scmp.lt.s32.totalorder %s151_s4, %s151_s4 }
  0x1d   :  { %p158_p0 = por %p157_p13, %p156_p12 }
  0x1f   :  { %p159_p1 = pnand %p158_p0, %p152_p11 }
  0x21   :  { %162 = shalt.err (!%p159_p1)
}
  0x22   :  { %33 = dma.hbm_to_vmem [thread:$0]  %s248_s1, 256, %s28_s24, [#allocation6], %s192_s19, %s192_s19, %s193_s20  }
  0x23   :  { %185 = dma.done.wait [#allocation3], 256  }
  0x24   :  { %186 = vsyncadd [#allocation3], 4294967040 }
  0x25   :  { %187 = dma.done.wait [#allocation6], 256  }
  0x26   :  { %188 = vsyncadd [#allocation6], 4294967040  ;;  %v45_v0 = vld [vmem:[#allocation2] sm:$0xff]  ;;  %v46_v1 = vld [vmem:[#allocation2 + $0x8] sm:$0xff]  ;;  %s195_s1 = smov [#allocation7]  }
  0x27   :  { %107 = vlog2.f32 %v45_v0  ;;  %v55_v2 = vsub.f32 1.0, %v45_v0  ;;  %v56_v3 = vsub.f32 1.0, %v46_v1  ;;  %v47_v15 = vld [vmem:[#allocation5] sm:$0xff]  ;;  %v48_v17 = vld [vmem:[#allocation5 + $0x8] sm:$0xff]  ;;  %s91_s6 = sshll.u32 %s195_s1, 4  ;;  %s92_s6 = int_to_ptr.vmem [resolvable:$true] %s91_s6 }
  0x28   :  { %109 = vlog2.f32 %v46_v1  ;;  %s163_s7 = scalar_lea.vmem %s92_s6, 128  ;;  %p168_p3 = scmp.lt.s32.totalorder %s92_s6, %s92_s6 }
  0x29   :  { %111 = vlog2.f32 %v55_v2  ;;  %p164_p2 = scmp.ne.s32.totalorder %s92_s6, %s163_s7  ;;  %p169_p4 = scmp.lt.s32.totalorder %s163_s7, %s163_s7 }
  0x2a   :  { %113 = vlog2.f32 %v56_v3 }
  0x2b   :  { %p170_p5 = por %p169_p4, %p168_p3 }
  0x2d   :  { %p171_p6 = pnand %p170_p5, %p164_p2 }
  0x31   :  { %v108_v4 = vpop.eup %107 }
  0x32   :  { %v110_v5 = vpop.eup %109  ;;  %v50_v6 = vmul.f32 0.6931472, %v108_v4 }
  0x33   :  { %v112_v7 = vpop.eup %111  ;;  %v52_v8 = vmul.f32 0.6931472, %v110_v5 }
  0x34   :  { %v114_v9 = vpop.eup %113  ;;  %v53_v10 = vmax.f32 %v50_v6, -100.0  ;;  %v58_v11 = vmul.f32 0.6931472, %v112_v7 }
  0x35   :  { %v54_v12 = vmax.f32 %v52_v8, -100.0  ;;  %v60_v13 = vmul.f32 0.6931472, %v114_v9 }
  0x36   :  { %v61_v14 = vmax.f32 %v58_v11, -100.0 }
  0x37   :  { %v62_v16 = vmax.f32 %v60_v13, -100.0 }
  0x38   :  { %v63_v18 = vsub.f32 %v53_v10, %v61_v14 }
  0x39   :  { %v64_v19 = vsub.f32 %v54_v12, %v62_v16 }
  0x3a   :  { %v65_v20 = vmul.f32 %v63_v18, %v47_v15 }
  0x3b   :  { %v66_v21 = vmul.f32 %v64_v19, %v48_v17 }
  0x3c   :  { %v67_v22 = vadd.f32 %v65_v20, %v61_v14 }
  0x3d   :  { %v68_v23 = vadd.f32 %v66_v21, %v62_v16 }
  0x3e   :  { %v71_v24 = vmul.f32 1.442695, %v67_v22  ;;  %v69_v28 = vsub.f32 0.0, %v67_v22 }
  0x3f   :  { %v73_v25 = vmul.f32 1.442695, %v68_v23  ;;  %v70_v30 = vsub.f32 0.0, %v68_v23 }
  0x40   :  { %115 = vpow2.f32 %v71_v24 }
  0x41   :  { %117 = vpow2.f32 %v73_v25 }
  0x4a   :  { %v116_v26 = vpop.eup %115 }
  0x4b   :  { %v118_v27 = vpop.eup %117  ;;  %v75_v29 = vsub.f32 1.0, %v116_v26 }
  0x4c   :  { %v76_v31 = vsub.f32 1.0, %v118_v27 }
  0x4d   :  { %v77_v32 = vmul.f32 %v75_v29, %v75_v29 }
  0x4e   :  { %v78_v33 = vmul.f32 %v76_v31, %v76_v31 }
  0x4f   :  { %v79_v34 = vmul.f32 %v77_v32, %v69_v28 }
  0x50   :  { %v80_v35 = vmul.f32 %v78_v33, %v70_v30 }
  0x52   :  { %v82_v36 = vadd.f32 %v80_v35, %v79_v34 }
  0x54   :  { %84 = vst [vmem:[#allocation7] sm:$0xff] %v82_v36 }
  0x55   :  { %174 = shalt.err (!%p171_p6)
}
  0x56   :  { %s175_s10 = scalar_lea.hbm %s249_s2, 128 }
  0x57   :  { %p176_p7 = scmp.ne.s32.totalorder %s249_s2, %s175_s10  ;;  %p179_p8 = scmp.lt.u32.totalorder %s175_s10, %s249_s2 }
  0x59   :  { %p181_p9 = pnand %p179_p8, %p176_p7 }
  0x5b   :  { %184 = shalt.err (!%p181_p9)
}
  0x5c   :  { %94 = dma.vmem_to_hbm [thread:$0]  %s92_s6, 128, %s249_s2, [#allocation4]  }
  0x5d   :  { %189 = dma.done.wait [#allocation4], 128  }
  0x5e   :  { %190 = vsyncadd [#allocation4], 4294967168 }
  0x5f   :  { %98 = vsyncpa [#allocation3], 1 }
  0x60   :  { %99 = vsyncpa [#allocation6], 1 }
  0x61   :  { %100 = vsyncpa [#allocation4], 1 }

</bundles_post_ra>
